<compile_context>
chip_gen: v7x
topology: tpu7x:2x2x1
jax: 0.10.0
libtpu: 0.0.40
codegen_flags: <defaults>
</compile_context>

<pallas_src>
import functools

import jax
import jax.numpy as jnp
from jax.experimental import pallas as pl
from jax.experimental.pallas import tpu as pltpu

# Scoped-VMEM budget: sized to fit comfortably inside v7x's 64 MiB physical
# VMEM (v5e/v6e have 128 MiB, so this is safe on every targeted chip).
_VMEM_LIMIT_BYTES = 48 * 1024 * 1024
_ROW_TILE = 256          # row tile for the linear / final kernels
_LN_EPS = 1e-5


def _row_tile(m):
    # Biggest row tile <= _ROW_TILE; use the full extent when already small.
    return m if m <= _ROW_TILE else _ROW_TILE


# ---------------------------------------------------------------------------
# Kernel 1: fused q/k/v projections   y = x @ W + b
#   row-tiled grid, weights resident across the grid, "parallel" row axis.
# ---------------------------------------------------------------------------
def _qkv_kernel(kx_ref, vx_ref, qx_ref, wk_ref, wv_ref, wq_ref,
                bk_ref, bv_ref, bq_ref, ko_ref, vo_ref, qo_ref,
                *, compute_dtype):
    def proj(x_ref, w_ref, b_ref, o_ref):
        acc = jnp.dot(x_ref[...].astype(compute_dtype), w_ref[...],
                      preferred_element_type=jnp.float32)
        o_ref[...] = (acc + b_ref[...]).astype(o_ref.dtype)

    proj(kx_ref, wk_ref, bk_ref, ko_ref)
    proj(vx_ref, wv_ref, bv_ref, vo_ref)
    proj(qx_ref, wq_ref, bq_ref, qo_ref)


def pallas_qkv_proj(key2d, value2d, query2d, wk, wv, wq, bk, bv, bq,
                    *, compute_dtype):
    M, D = query2d.shape
    N = wq.shape[1]
    tm = _row_tile(M)
    grid = (pl.cdiv(M, tm),)

    x_spec = pl.BlockSpec((tm, D), lambda i: (i, 0))
    w_spec = pl.BlockSpec((D, N), lambda i: (0, 0))   # resident across grid
    b_spec = pl.BlockSpec((1, N), lambda i: (0, 0))
    o_spec = pl.BlockSpec((tm, N), lambda i: (i, 0))
    out_sd = jax.ShapeDtypeStruct((M, N), compute_dtype)

    kernel = functools.partial(_qkv_kernel, compute_dtype=compute_dtype)
    return pl.pallas_call(
        kernel,
        grid=grid,
        out_shape=(out_sd, out_sd, out_sd),
        in_specs=[x_spec, x_spec, x_spec,
                  w_spec, w_spec, w_spec,
                  b_spec, b_spec, b_spec],
        out_specs=(o_spec, o_spec, o_spec),
        compiler_params=pltpu.CompilerParams(
            dimension_semantics=("parallel",),
            vmem_limit_bytes=_VMEM_LIMIT_BYTES),
    )(key2d, value2d, query2d,
      wk.astype(compute_dtype), wv.astype(compute_dtype), wq.astype(compute_dtype),
      bk.reshape(1, N), bv.reshape(1, N), bq.reshape(1, N))


# ---------------------------------------------------------------------------
# Kernel 2: scaled dot-product attention, a group of heads per grid step
#   scores = (q*scale) @ k^T ; softmax(dim=2) ; context = softmax @ v
# ---------------------------------------------------------------------------
def _attention_kernel(q_ref, k_ref, v_ref, ctx_ref, attn_ref,
                      *, scale, compute_dtype, approx_recip):
    # Fold the scale into q: touches S*d elements instead of S*S scores.
    q = (q_ref[...].astype(jnp.float32) * scale).astype(compute_dtype)
    k = k_ref[...].astype(compute_dtype)
    v = v_ref[...].astype(compute_dtype)

    # Batched QK^T: contract the shared head dim directly (no k.T transpose).
    s = jax.lax.dot_general(
        q, k, dimension_numbers=(((2,), (2,)), ((0,), (0,))),
        preferred_element_type=jnp.float32)                  # (Hblk, S, S)

    m = jnp.max(s, axis=-1, keepdims=True)
    e = jnp.exp(s - m)
    denom = jnp.sum(e, axis=-1, keepdims=True)
    p = e * pl.reciprocal(denom, approx=approx_recip)        # softmax(dim=2)
    attn_ref[...] = p.astype(attn_ref.dtype)                 # dropout(p=0)=id

    ctx = jax.lax.dot_general(
        p.astype(compute_dtype), v,
        dimension_numbers=(((2,), (1,)), ((0,), (0,))),
        preferred_element_type=jnp.float32)                  # (Hblk, S, d)
    ctx_ref[...] = ctx.astype(ctx_ref.dtype)


def _pick_head_block(num_bh, d):
    # Group heads so one grid step covers >= ~256 elements of head*d work:
    # amortizes per-step overhead and keeps loads/stores closer to lane-dense.
    target = max(1, 256 // max(d, 1))
    hblk = min(num_bh, target)
    while num_bh % hblk:
        hblk -= 1
    return hblk


def pallas_attention(q, k, v, scale, *, compute_dtype,
                     attn_dtype=jnp.float32, approx_recip=True):
    BH, S, d = q.shape
    hblk = _pick_head_block(BH, d)
    grid = (BH // hblk,)

    qkv_spec = pl.BlockSpec((hblk, S, d), lambda i: (i, 0, 0))
    attn_spec = pl.BlockSpec((hblk, S, S), lambda i: (i, 0, 0))

    kernel = functools.partial(_attention_kernel, scale=scale,
                               compute_dtype=compute_dtype,
                               approx_recip=approx_recip)
    # NOTE: the full (Hblk, S, S) score block is held per step; for large S a
    # flash-style KV-tiled variant (online max/sum, "arbitrary" KV axis) and a
    # fused attention->final epilogue would be the next step.
    return pl.pallas_call(
        kernel,
        grid=grid,
        out_shape=(jax.ShapeDtypeStruct((BH, S, d), compute_dtype),
                   jax.ShapeDtypeStruct((BH, S, S), attn_dtype)),
        in_specs=[qkv_spec, qkv_spec, qkv_spec],
        out_specs=(qkv_spec, attn_spec),
        compiler_params=pltpu.CompilerParams(
            dimension_semantics=("parallel",),
            vmem_limit_bytes=_VMEM_LIMIT_BYTES),
    )(q, k, v)


# ---------------------------------------------------------------------------
# Kernel 3: fused  linear_final -> ReLU -> residual add -> LayerNorm
#   row-tiled grid, weight resident across the grid, "parallel" row axis.
# ---------------------------------------------------------------------------
def _final_kernel(c_ref, w_ref, b_ref, r_ref, g_ref, be_ref, o_ref,
                  *, compute_dtype):
    y = jnp.dot(c_ref[...].astype(compute_dtype), w_ref[...],
                preferred_element_type=jnp.float32) + b_ref[...]
    y = jnp.maximum(y, 0.0)                        # ReLU (dropout p=0 = id)
    x = r_ref[...] + y                             # residual add (f32)
    mu = jnp.mean(x, axis=-1, keepdims=True)
    var = jnp.mean(jnp.square(x - mu), axis=-1, keepdims=True)
    o_ref[...] = ((x - mu) * jax.lax.rsqrt(var + _LN_EPS)) * g_ref[...] + be_ref[...]


def pallas_final(ctx2d, w, b, res2d, gamma, beta, *, compute_dtype):
    M, K = ctx2d.shape
    N = w.shape[1]
    tm = _row_tile(M)
    grid = (pl.cdiv(M, tm),)

    kernel = functools.partial(_final_kernel, compute_dtype=compute_dtype)
    return pl.pallas_call(
        kernel,
        grid=grid,
        out_shape=jax.ShapeDtypeStruct((M, N), jnp.float32),
        in_specs=[pl.BlockSpec((tm, K), lambda i: (i, 0)),
                  pl.BlockSpec((K, N), lambda i: (0, 0)),    # resident weight
                  pl.BlockSpec((1, N), lambda i: (0, 0)),
                  pl.BlockSpec((tm, N), lambda i: (i, 0)),
                  pl.BlockSpec((1, N), lambda i: (0, 0)),
                  pl.BlockSpec((1, N), lambda i: (0, 0))],
        out_specs=pl.BlockSpec((tm, N), lambda i: (i, 0)),
        compiler_params=pltpu.CompilerParams(
            dimension_semantics=("parallel",),
            vmem_limit_bytes=_VMEM_LIMIT_BYTES),
    )(ctx2d, w.astype(compute_dtype), b.reshape(1, N), res2d,
      gamma.reshape(1, N), beta.reshape(1, N))


# ---------------------------------------------------------------------------
# Full forward pass (glue in plain JAX, compute in Pallas kernels)
# ---------------------------------------------------------------------------
def multi_head_attention(key, value, query, params, num_heads,
                         *, compute_dtype=jnp.float32, approx_softmax=None):
    if approx_softmax is None:
        approx_softmax = jnp.dtype(compute_dtype) != jnp.dtype(jnp.float32)
    B, S, D = query.shape
    d = D // num_heads
    residual = query

    k2d, v2d, q2d = pallas_qkv_proj(
        key.reshape(B * S, D), value.reshape(B * S, D), query.reshape(B * S, D),
        params["wk"], params["wv"], params["wq"],
        params["bk"], params["bv"], params["bq"],
        compute_dtype=compute_dtype)

    # PyTorch's `.view(B*H, -1, d)` on the contiguous projection buffer:
    # a free flat reshape (no data movement in XLA), faithful to the module.
    kh = k2d.reshape(B * num_heads, -1, d)
    vh = v2d.reshape(B * num_heads, -1, d)
    qh = q2d.reshape(B * num_heads, -1, d)

    # scale = (key.size(-1) // num_heads) ** -0.5  (integer //, as in PyTorch)
    scale = float((d // num_heads) ** (-0.5))

    context, attention = pallas_attention(
        qh, kh, vh, scale, compute_dtype=compute_dtype,
        approx_recip=approx_softmax)

    # `.view(B, -1, d*H)` merge + row-flatten: again free flat reshapes.
    ctx2d = context.reshape(B * S, D)
    out2d = pallas_final(ctx2d, params["wf"], params["bf"],
                         residual.reshape(B * S, D),
                         params["gamma"], params["beta"],
                         compute_dtype=compute_dtype)
    return out2d.reshape(B, S, D), attention.astype(jnp.float32)


# ---------------------------------------------------------------------------
# Pure-JAX reference for a sanity check
# ---------------------------------------------------------------------------
def reference(key, value, query, params, num_heads):
    B, S, D = query.shape
    d = D // num_heads
    residual = query
    k = key.reshape(-1, D) @ params["wk"] + params["bk"]
    v = value.reshape(-1, D) @ params["wv"] + params["bv"]
    q = query.reshape(-1, D) @ params["wq"] + params["bq"]
    k = k.reshape(B * num_heads, -1, d)
    v = v.reshape(B * num_heads, -1, d)
    q = q.reshape(B * num_heads, -1, d)
    scale = float((d // num_heads) ** (-0.5))
    s = jnp.einsum("bij,bkj->bik", q, k) * scale
    p = jax.nn.softmax(s, axis=2)
    ctx = jnp.einsum("bik,bkj->bij", p, v).reshape(B, -1, d * num_heads)
    y = ctx.reshape(-1, D) @ params["wf"] + params["bf"]
    y = jnp.maximum(y, 0.0)
    x = residual.reshape(-1, D) + y
    mu = jnp.mean(x, axis=-1, keepdims=True)
    var = jnp.mean(jnp.square(x - mu), axis=-1, keepdims=True)
    o = (x - mu) * jax.lax.rsqrt(var + _LN_EPS) * params["gamma"] + params["beta"]
    return o.reshape(B, S, D), p


if __name__ == "__main__":
    # Small shapes consistent with the module's forward.
    B, S = 2, 8
    model_dim, num_heads = 32, 4          # dim_per_head = 8

    root = jax.random.PRNGKey(0)
    keys = jax.random.split(root, 12)

    def init_w(k, shape):
        return 0.1 * jax.random.normal(k, shape, dtype=jnp.float32)

    params = {
        "wk": init_w(keys[0], (model_dim, model_dim)),
        "bk": init_w(keys[1], (model_dim,)),
        "wv": init_w(keys[2], (model_dim, model_dim)),
        "bv": init_w(keys[3], (model_dim,)),
        "wq": init_w(keys[4], (model_dim, model_dim)),
        "bq": init_w(keys[5], (model_dim,)),
        "wf": init_w(keys[6], (model_dim, model_dim)),
        "bf": init_w(keys[7], (model_dim,)),
        # nn.LayerNorm default init: weight = 1, bias = 0
        "gamma": jnp.ones((model_dim,), dtype=jnp.float32),
        "beta": jnp.zeros((model_dim,), dtype=jnp.float32),
    }

    key_in = jax.random.normal(keys[8], (B, S, model_dim), dtype=jnp.float32)
    value_in = jax.random.normal(keys[9], (B, S, model_dim), dtype=jnp.float32)
    query_in = jax.random.normal(keys[10], (B, S, model_dim), dtype=jnp.float32)

    ref_out, ref_attn = reference(key_in, value_in, query_in, params, num_heads)

    # Strict f32 path (exact softmax reciprocal) vs. pure-JAX reference.
    out, attn = multi_head_attention(key_in, value_in, query_in, params,
                                     num_heads, compute_dtype=jnp.float32,
                                     approx_softmax=False)
    out = jax.block_until_ready(out)
    attn = jax.block_until_ready(attn)
    assert jnp.allclose(out, ref_out, atol=1e-3, rtol=1e-3)
    assert jnp.allclose(attn, ref_attn, atol=1e-3, rtol=1e-3)

    # Fast path: bf16 MXU operands (f32 accumulation) + approx EUP reciprocal.
    out_bf, attn_bf = multi_head_attention(key_in, value_in, query_in, params,
                                           num_heads, compute_dtype=jnp.bfloat16)
    out_bf = jax.block_until_ready(out_bf)
    attn_bf = jax.block_until_ready(attn_bf)
    assert jnp.allclose(out_bf, ref_out, atol=5e-2, rtol=5e-2)
    assert jnp.allclose(attn_bf, ref_attn, atol=5e-2, rtol=5e-2)

    print("KERNEL_OK")
</pallas_src>

<mosaic_0001>
module attributes {stable_mosaic.version = 11 : i64} {
  func.func @_qkv_kernel(%arg0: i32, %arg1: memref<16x32xf32, #tpu.memory_space<vmem>>, %arg2: memref<16x32xf32, #tpu.memory_space<vmem>>, %arg3: memref<16x32xf32, #tpu.memory_space<vmem>>, %arg4: memref<32x32xf32, #tpu.memory_space<vmem>>, %arg5: memref<32x32xf32, #tpu.memory_space<vmem>>, %arg6: memref<32x32xf32, #tpu.memory_space<vmem>>, %arg7: memref<1x32xf32, #tpu.memory_space<vmem>>, %arg8: memref<1x32xf32, #tpu.memory_space<vmem>>, %arg9: memref<1x32xf32, #tpu.memory_space<vmem>>, %arg10: memref<16x32xf32, #tpu.memory_space<vmem>>, %arg11: memref<16x32xf32, #tpu.memory_space<vmem>>, %arg12: memref<16x32xf32, #tpu.memory_space<vmem>>) attributes {dimension_semantics = [#tpu.dimension_semantics<parallel>], iteration_bounds = array<i64: 1>, scalar_prefetch = 0 : i64, scratch_operands = 0 : i64, tpu.core_type = #tpu.core_type<tc>, window_params = [{transform_indices = @transform_0, window_bounds = array<i64: 16, 32>}, {transform_indices = @transform_1, window_bounds = array<i64: 16, 32>}, {transform_indices = @transform_2, window_bounds = array<i64: 16, 32>}, {pipeline_mode = #tpu.pipeline_mode<synchronous>, transform_indices = @transform_3, window_bounds = array<i64: 32, 32>}, {pipeline_mode = #tpu.pipeline_mode<synchronous>, transform_indices = @transform_4, window_bounds = array<i64: 32, 32>}, {pipeline_mode = #tpu.pipeline_mode<synchronous>, transform_indices = @transform_5, window_bounds = array<i64: 32, 32>}, {pipeline_mode = #tpu.pipeline_mode<synchronous>, transform_indices = @transform_6, window_bounds = array<i64: 1, 32>}, {pipeline_mode = #tpu.pipeline_mode<synchronous>, transform_indices = @transform_7, window_bounds = array<i64: 1, 32>}, {pipeline_mode = #tpu.pipeline_mode<synchronous>, transform_indices = @transform_8, window_bounds = array<i64: 1, 32>}, {transform_indices = @transform_9, window_bounds = array<i64: 16, 32>}, {transform_indices = @transform_10, window_bounds = array<i64: 16, 32>}, {transform_indices = @transform_11, window_bounds = array<i64: 16, 32>}]} {
    %c0 = arith.constant 0 : index
    %c0_0 = arith.constant 0 : index
    %0 = vector.load %arg1[%c0, %c0_0] : memref<16x32xf32, #tpu.memory_space<vmem>>, vector<16x32xf32>
    %c0_1 = arith.constant 0 : index
    %c0_2 = arith.constant 0 : index
    %1 = vector.load %arg4[%c0_1, %c0_2] : memref<32x32xf32, #tpu.memory_space<vmem>>, vector<32x32xf32>
    %cst = arith.constant dense<0.000000e+00> : vector<16x32xf32>
    %2 = tpu.matmul %0, %1, %cst {dimension_numbers = #tpu.dot_dimension_numbers<[1], [0], [0], [1], [0, 0, 1, 1], [], []>} : vector<16x32xf32>, vector<32x32xf32>, vector<16x32xf32> -> vector<16x32xf32>
    %c0_3 = arith.constant 0 : index
    %c0_4 = arith.constant 0 : index
    %3 = vector.load %arg7[%c0_3, %c0_4] : memref<1x32xf32, #tpu.memory_space<vmem>>, vector<1x32xf32>
    %4 = vector.broadcast %3 : vector<1x32xf32> to vector<16x32xf32>
    %5 = arith.addf %2, %4 : vector<16x32xf32>
    %c0_5 = arith.constant 0 : index
    %c0_6 = arith.constant 0 : index
    %6 = vector.load %arg10[%c0_5, %c0_6] : memref<16x32xf32, #tpu.memory_space<vmem>>, vector<16x32xf32>
    tpu.vector_store %arg10[%c0_5, %c0_6], %5 {strides = array<i32>} : memref<16x32xf32, #tpu.memory_space<vmem>>, vector<16x32xf32>,
    %c0_7 = arith.constant 0 : index
    %c0_8 = arith.constant 0 : index
    %7 = vector.load %arg2[%c0_7, %c0_8] : memref<16x32xf32, #tpu.memory_space<vmem>>, vector<16x32xf32>
    %c0_9 = arith.constant 0 : index
    %c0_10 = arith.constant 0 : index
    %8 = vector.load %arg5[%c0_9, %c0_10] : memref<32x32xf32, #tpu.memory_space<vmem>>, vector<32x32xf32>
    %cst_11 = arith.constant dense<0.000000e+00> : vector<16x32xf32>
    %9 = tpu.matmul %7, %8, %cst_11 {dimension_numbers = #tpu.dot_dimension_numbers<[1], [0], [0], [1], [0, 0, 1, 1], [], []>} : vector<16x32xf32>, vector<32x32xf32>, vector<16x32xf32> -> vector<16x32xf32>
    %c0_12 = arith.constant 0 : index
    %c0_13 = arith.constant 0 : index
    %10 = vector.load %arg8[%c0_12, %c0_13] : memref<1x32xf32, #tpu.memory_space<vmem>>, vector<1x32xf32>
    %11 = vector.broadcast %10 : vector<1x32xf32> to vector<16x32xf32>
    %12 = arith.addf %9, %11 : vector<16x32xf32>
    %c0_14 = arith.constant 0 : index
    %c0_15 = arith.constant 0 : index
    %13 = vector.load %arg11[%c0_14, %c0_15] : memref<16x32xf32, #tpu.memory_space<vmem>>, vector<16x32xf32>
    tpu.vector_store %arg11[%c0_14, %c0_15], %12 {strides = array<i32>} : memref<16x32xf32, #tpu.memory_space<vmem>>, vector<16x32xf32>,
    %c0_16 = arith.constant 0 : index
    %c0_17 = arith.constant 0 : index
    %14 = vector.load %arg3[%c0_16, %c0_17] : memref<16x32xf32, #tpu.memory_space<vmem>>, vector<16x32xf32>
    %c0_18 = arith.constant 0 : index
    %c0_19 = arith.constant 0 : index
    %15 = vector.load %arg6[%c0_18, %c0_19] : memref<32x32xf32, #tpu.memory_space<vmem>>, vector<32x32xf32>
    %cst_20 = arith.constant dense<0.000000e+00> : vector<16x32xf32>
    %16 = tpu.matmul %14, %15, %cst_20 {dimension_numbers = #tpu.dot_dimension_numbers<[1], [0], [0], [1], [0, 0, 1, 1], [], []>} : vector<16x32xf32>, vector<32x32xf32>, vector<16x32xf32> -> vector<16x32xf32>
    %c0_21 = arith.constant 0 : index
    %c0_22 = arith.constant 0 : index
    %17 = vector.load %arg9[%c0_21, %c0_22] : memref<1x32xf32, #tpu.memory_space<vmem>>, vector<1x32xf32>
    %18 = vector.broadcast %17 : vector<1x32xf32> to vector<16x32xf32>
    %19 = arith.addf %16, %18 : vector<16x32xf32>
    %c0_23 = arith.constant 0 : index
    %c0_24 = arith.constant 0 : index
    %20 = vector.load %arg12[%c0_23, %c0_24] : memref<16x32xf32, #tpu.memory_space<vmem>>, vector<16x32xf32>
    tpu.vector_store %arg12[%c0_23, %c0_24], %19 {strides = array<i32>} : memref<16x32xf32, #tpu.memory_space<vmem>>, vector<16x32xf32>,
    return
  }
  func.func @transform_0(%arg0: i32) -> (i32, i32) {
    %c0_i32 = arith.constant 0 : i32
    %c0_i32_0 = arith.constant 0 : i32
    return %arg0, %c0_i32 : i32, i32
  }
  func.func @transform_1(%arg0: i32) -> (i32, i32) {
    %c0_i32 = arith.constant 0 : i32
    %c0_i32_0 = arith.constant 0 : i32
    return %arg0, %c0_i32 : i32, i32
  }
  func.func @transform_2(%arg0: i32) -> (i32, i32) {
    %c0_i32 = arith.constant 0 : i32
    %c0_i32_0 = arith.constant 0 : i32
    return %arg0, %c0_i32 : i32, i32
  }
  func.func @transform_3(%arg0: i32) -> (i32, i32) {
    %c0_i32 = arith.constant 0 : i32
    %c0_i32_0 = arith.constant 0 : i32
    %c0_i32_1 = arith.constant 0 : i32
    return %c0_i32, %c0_i32_0 : i32, i32
  }
  func.func @transform_4(%arg0: i32) -> (i32, i32) {
    %c0_i32 = arith.constant 0 : i32
    %c0_i32_0 = arith.constant 0 : i32
    %c0_i32_1 = arith.constant 0 : i32
    return %c0_i32, %c0_i32_0 : i32, i32
  }
  func.func @transform_5(%arg0: i32) -> (i32, i32) {
    %c0_i32 = arith.constant 0 : i32
    %c0_i32_0 = arith.constant 0 : i32
    %c0_i32_1 = arith.constant 0 : i32
    return %c0_i32, %c0_i32_0 : i32, i32
  }
  func.func @transform_6(%arg0: i32) -> (i32, i32) {
    %c0_i32 = arith.constant 0 : i32
    %c0_i32_0 = arith.constant 0 : i32
    %c0_i32_1 = arith.constant 0 : i32
    return %c0_i32, %c0_i32_0 : i32, i32
  }
  func.func @transform_7(%arg0: i32) -> (i32, i32) {
    %c0_i32 = arith.constant 0 : i32
    %c0_i32_0 = arith.constant 0 : i32
    %c0_i32_1 = arith.constant 0 : i32
    return %c0_i32, %c0_i32_0 : i32, i32
  }
  func.func @transform_8(%arg0: i32) -> (i32, i32) {
    %c0_i32 = arith.constant 0 : i32
    %c0_i32_0 = arith.constant 0 : i32
    %c0_i32_1 = arith.constant 0 : i32
    return %c0_i32, %c0_i32_0 : i32, i32
  }
  func.func @transform_9(%arg0: i32) -> (i32, i32) {
    %c0_i32 = arith.constant 0 : i32
    %c0_i32_0 = arith.constant 0 : i32
    return %arg0, %c0_i32 : i32, i32
  }
  func.func @transform_10(%arg0: i32) -> (i32, i32) {
    %c0_i32 = arith.constant 0 : i32
    %c0_i32_0 = arith.constant 0 : i32
    return %arg0, %c0_i32 : i32, i32
  }
  func.func @transform_11(%arg0: i32) -> (i32, i32) {
    %c0_i32 = arith.constant 0 : i32
    %c0_i32_0 = arith.constant 0 : i32
    return %arg0, %c0_i32 : i32, i32
  }
}

</mosaic_0001>

<bundles_post_ra>
// kernel: tpu_custom_call.1
= control target key start
LH: loop header
LB: loop body
LE: loop exit
PB: predicated region body
PF: predicated region fallthrough
CT: control target
= control target key end

     0   :  { %17 = vsyncpa [#allocation3], 0  ;;  %s1019_s0 = inlined_call_operand.hbm [shape: f32[16,32], index: 0, kind: input, shape index: {}]   ;;  %s1020_s1 = inlined_call_operand.hbm [shape: f32[16,32], index: 1, kind: input, shape index: {}]   ;;  %s1021_s2 = inlined_call_operand.hbm [shape: f32[16,32], index: 2, kind: input, shape index: {}]   ;;  %s1022_s3 = inlined_call_operand.hbm [shape: f32[32,32], index: 3, kind: input, shape index: {}]   ;;  %s1023_s4 = inlined_call_operand.hbm [shape: f32[32,32], index: 4, kind: input, shape index: {}]   ;;  %s1024_s5 = inlined_call_operand.hbm [shape: f32[32,32], index: 5, kind: input, shape index: {}]   ;;  %s1025_s6 = inlined_call_operand.vmem [shape: f32[1,32], index: 6, kind: input, shape index: {}]   ;;  %s1026_s7 = inlined_call_operand.vmem [shape: f32[1,32], index: 7, kind: input, shape index: {}]   ;;  %s1027_s8 = inlined_call_operand.vmem [shape: f32[1,32], index: 8, kind: input, shape index: {}]   ;;  %s1028_s9 = inlined_call_operand.hbm [shape: f32[16,32], index: 9, kind: output, shape index: {0}]   ;;  %s1029_s10 = inlined_call_operand.hbm [shape: f32[16,32], index: 10, kind: output, shape index: {1}]   ;;  %s1030_s11 = inlined_call_operand.hbm [shape: f32[16,32], index: 11, kind: output, shape index: {2}]  }
   0x1   :  { %18 = vsyncpa [#allocation6], 0 }
   0x2   :  { %19 = vsyncpa [#allocation9], 0 }
   0x3   :  { %20 = vsyncpa [#allocation12], 0 }
   0x4   :  { %21 = vsyncpa [#allocation4], 0 }
   0x5   :  { %22 = vsyncpa [#allocation15], 0  ;;  %s764_s17 = smov [#allocation5]   ;;  %s765_s19 = smov [#allocation8]  }
   0x6   :  { %s40_s18 = sshll.u32 %s764_s17, 4  ;;  %s64_s20 = sshll.u32 %s765_s19, 4  ;;  %s41_s18 = int_to_ptr.vmem [resolvable:$true] %s40_s18  ;;  %s835_s20 = int_to_ptr.vmem [resolvable:$true] %s64_s20 }
   0x7   :  { %s554_s23 = scalar_lea.hbm %s1020_s1, 256 }
   0x8   :  { %p555_p0 = scmp.ne.s32.totalorder %s1020_s1, %s554_s23  ;;  %p558_p1 = scmp.lt.u32.totalorder %s554_s23, %s1020_s1 }
   0xa   :  { %p560_p2 = pnand %p558_p1, %p555_p0 }
   0xc   :  { %563 = shalt.err (!%p560_p2)
}
   0xd   :  { %s564_s28 = scalar_lea.vmem %s41_s18, 256  ;;  %p569_p4 = scmp.lt.s32.totalorder %s41_s18, %s41_s18 }
   0xe   :  { %p565_p3 = scmp.ne.s32.totalorder %s41_s18, %s564_s28  ;;  %p570_p5 = scmp.lt.s32.totalorder %s564_s28, %s564_s28 }
  0x10   :  { %p571_p6 = por %p570_p5, %p569_p4 }
  0x12   :  { %p572_p7 = pnand %p571_p6, %p565_p3 }
  0x14   :  { %575 = shalt.err (!%p572_p7)
}
  0x15   :  { %s766_s29 = smov 128   ;;  %s767_s30 = smov 8  }
  0x16   :  { %46 = dma.hbm_to_vmem [thread:$0]  %s1020_s1, 256, %s41_s18, [#allocation6], %s766_s29, %s766_s29, %s767_s30  }
  0x17   :  { %s576_s16 = scalar_lea.hbm %s1022_s3, 512 }
  0x18   :  { %p577_p8 = scmp.ne.s32.totalorder %s1022_s3, %s576_s16  ;;  %p580_p9 = scmp.lt.u32.totalorder %s576_s16, %s1022_s3 }
  0x1a   :  { %p582_p10 = pnand %p580_p9, %p577_p8 }
  0x1c   :  { %585 = shalt.err (!%p582_p10)
}
  0x1d   :  { %s586_s23 = scalar_lea.vmem %s835_s20, 512  ;;  %p591_p12 = scmp.lt.s32.totalorder %s835_s20, %s835_s20 }
  0x1e   :  { %p587_p11 = scmp.ne.s32.totalorder %s835_s20, %s586_s23  ;;  %p592_p13 = scmp.lt.s32.totalorder %s586_s23, %s586_s23 }
  0x20   :  { %p593_p0 = por %p592_p13, %p591_p12 }
  0x22   :  { %p594_p1 = pnand %p593_p0, %p587_p11 }
  0x24   :  { %597 = shalt.err (!%p594_p1)
}
  0x25   :  { %70 = dma.hbm_to_vmem [thread:$0]  %s1022_s3, 512, %s835_s20, [#allocation9], %s766_s29, %s766_s29, %s767_s30  }
  0x26   :  { %s768_s24 = smov [#allocation2]   ;;  %s769_s26 = smov [#allocation7]  }
  0x27   :  { %s28_s25 = sshll.u32 %s768_s24, 4  ;;  %s52_s27 = sshll.u32 %s769_s26, 4  ;;  %s29_s25 = int_to_ptr.vmem [resolvable:$true] %s28_s25  ;;  %s872_s27 = int_to_ptr.vmem [resolvable:$true] %s52_s27 }
  0x28   :  { %s598_s13 = scalar_lea.hbm %s1019_s0, 256 }
  0x29   :  { %p599_p2 = scmp.ne.s32.totalorder %s1019_s0, %s598_s13  ;;  %p602_p3 = scmp.lt.u32.totalorder %s598_s13, %s1019_s0 }
  0x2b   :  { %p604_p4 = pnand %p602_p3, %p599_p2 }
  0x2d   :  { %607 = shalt.err (!%p604_p4)
}
  0x2e   :  { %s608_s3 = scalar_lea.vmem %s29_s25, 256  ;;  %p613_p6 = scmp.lt.s32.totalorder %s29_s25, %s29_s25 }
  0x2f   :  { %p609_p5 = scmp.ne.s32.totalorder %s29_s25, %s608_s3  ;;  %p614_p7 = scmp.lt.s32.totalorder %s608_s3, %s608_s3 }
  0x31   :  { %p615_p8 = por %p614_p7, %p613_p6 }
  0x33   :  { %p616_p9 = pnand %p615_p8, %p609_p5 }
  0x35   :  { %619 = shalt.err (!%p616_p9)
}
  0x36   :  { %34 = dma.hbm_to_vmem [thread:$0]  %s1019_s0, 256, %s29_s25, [#allocation3], %s766_s29, %s766_s29, %s767_s30  }
  0x37   :  { %s620_s23 = scalar_lea.hbm %s1021_s2, 256 }
  0x38   :  { %p621_p10 = scmp.ne.s32.totalorder %s1021_s2, %s620_s23  ;;  %p624_p11 = scmp.lt.u32.totalorder %s620_s23, %s1021_s2 }
  0x3a   :  { %p626_p12 = pnand %p624_p11, %p621_p10 }
  0x3c   :  { %629 = shalt.err (!%p626_p12)
}
  0x3d   :  { %s630_s28 = scalar_lea.vmem %s872_s27, 256  ;;  %p635_p0 = scmp.lt.s32.totalorder %s872_s27, %s872_s27 }
  0x3e   :  { %p631_p13 = scmp.ne.s32.totalorder %s872_s27, %s630_s28  ;;  %p636_p1 = scmp.lt.s32.totalorder %s630_s28, %s630_s28 }
  0x40   :  { %p637_p2 = por %p636_p1, %p635_p0 }
  0x42   :  { %p638_p3 = pnand %p637_p2, %p631_p13 }
  0x44   :  { %641 = shalt.err (!%p638_p3)
}
  0x45   :  { %58 = dma.hbm_to_vmem [thread:$0]  %s1021_s2, 256, %s872_s27, [#allocation6], %s766_s29, %s766_s29, %s767_s30  }
  0x46   :  { %s770_s12 = smov [#allocation10]   ;;  %s771_s14 = smov [#allocation11]  }
  0x47   :  { %s76_s13 = sshll.u32 %s770_s12, 4  ;;  %s88_s15 = sshll.u32 %s771_s14, 4  ;;  %s77_s13 = int_to_ptr.vmem [resolvable:$true] %s76_s13  ;;  %s909_s15 = int_to_ptr.vmem [resolvable:$true] %s88_s15 }
  0x48   :  { %s642_s3 = scalar_lea.hbm %s1023_s4, 512 }
  0x49   :  { %p643_p4 = scmp.ne.s32.totalorder %s1023_s4, %s642_s3  ;;  %p646_p5 = scmp.lt.u32.totalorder %s642_s3, %s1023_s4 }
  0x4b   :  { %p648_p6 = pnand %p646_p5, %p643_p4 }
  0x4d   :  { %651 = shalt.err (!%p648_p6)
}
  0x4e   :  { %s652_s2 = scalar_lea.vmem %s77_s13, 512  ;;  %p657_p8 = scmp.lt.s32.totalorder %s77_s13, %s77_s13 }
  0x4f   :  { %p653_p7 = scmp.ne.s32.totalorder %s77_s13, %s652_s2  ;;  %p658_p9 = scmp.lt.s32.totalorder %s652_s2, %s652_s2 }
  0x51   :  { %p659_p10 = por %p658_p9, %p657_p8 }
  0x53   :  { %p660_p11 = pnand %p659_p10, %p653_p7 }
  0x55   :  { %663 = shalt.err (!%p660_p11)
}
  0x56   :  { %82 = dma.hbm_to_vmem [thread:$0]  %s1023_s4, 512, %s77_s13, [#allocation9], %s766_s29, %s766_s29, %s767_s30  }
  0x57   :  { %s664_s24 = scalar_lea.hbm %s1024_s5, 512 }
  0x58   :  { %p665_p12 = scmp.ne.s32.totalorder %s1024_s5, %s664_s24  ;;  %p668_p13 = scmp.lt.u32.totalorder %s664_s24, %s1024_s5 }
  0x5a   :  { %p670_p0 = pnand %p668_p13, %p665_p12 }
  0x5c   :  { %673 = shalt.err (!%p670_p0)
}
  0x5d   :  { %s674_s12 = scalar_lea.vmem %s909_s15, 512  ;;  %p679_p2 = scmp.lt.s32.totalorder %s909_s15, %s909_s15 }
  0x5e   :  { %p675_p1 = scmp.ne.s32.totalorder %s909_s15, %s674_s12  ;;  %p680_p3 = scmp.lt.s32.totalorder %s674_s12, %s674_s12 }
  0x60   :  { %p681_p4 = por %p680_p3, %p679_p2 }
  0x62   :  { %p682_p5 = pnand %p681_p4, %p675_p1 }
  0x64   :  { %685 = shalt.err (!%p682_p5)
}
  0x65   :  { %94 = dma.hbm_to_vmem [thread:$0]  %s1024_s5, 512, %s909_s15, [#allocation12], %s766_s29, %s766_s29, %s767_s30  }
  0x66   :  { %752 = dma.done.wait [#allocation3], 256  }
  0x67   :  { %753 = vsyncadd [#allocation3], 4294967040 }
  0x68   :  { %754 = dma.done.wait [#allocation6], 512  }
  0x69   :  { %755 = vsyncadd [#allocation6], 4294966784 }
  0x6a   :  { %756 = dma.done.wait [#allocation9], 1024  }
  0x6b   :  { %757 = vsyncadd [#allocation9], 4294966272 }
  0x6c   :  { %758 = dma.done.wait [#allocation12], 512  }
  0x6d   :  { %759 = vsyncadd [#allocation12], 4294966784  ;;  %v121_v0 = vld [vmem:[#allocation8] sm:$0xff]  ;;  %v122_v1 = vld [vmem:[#allocation8 + $0x8] sm:$0xff]  ;;  %vm132_vm0 = vcmask 261120   ;;  %s772_s17 = smov [#allocation13]  }
  0x6e   :  { %v123_v2 = vld [vmem:[#allocation8 + $0x10] sm:$0xff]  ;;  %v519_v3 = vpack.c.bf16 %v122_v1, %v121_v0  ;;  %v124_v4 = vld [vmem:[#allocation8 + $0x18] sm:$0xff]  ;;  %v218_v5 = vld [vmem:[#allocation10] sm:$0xff]  ;;  %s413_s3 = sshll.u32 %s772_s17, 4  ;;  %s773_s20 = smov [#allocation14]   ;;  %s414_s3 = int_to_ptr.vmem [resolvable:$true] %s413_s3 }
  0x6f   :  { %v219_v6 = vld [vmem:[#allocation10 + $0x8] sm:$0xff]  ;;  %v523_v7 = vpack.c.bf16 %v124_v4, %v123_v2  ;;  %v119_v9 = vld [vmem:[#allocation2] sm:$0xff]  ;;  %v314_v10 = vld [vmem:[#allocation11] sm:$0xff]  ;;  %s425_s19 = sshll.u32 %s773_s20, 4  ;;  %s686_s21 = scalar_lea.vmem %s414_s3, 256  ;;  %s959_s19 = int_to_ptr.vmem [resolvable:$true] %s425_s19 }
  0x70   :  { %v527_v8 = vpack.c.bf16 %v219_v6, %v218_v5  ;;  %520 = vmatprep.subr.bf16.mxu0 %v519_v3  ;;  %494 = vmatprep.mubr.msk.f32.mxu0 %vm132_vm0, %v119_v9  ;;  %v315_v11 = vld [vmem:[#allocation11 + $0x8] sm:$0xff]  ;;  %v220_v12 = vld [vmem:[#allocation10 + $0x10] sm:$0xff]  ;;  %v221_v13 = vld [vmem:[#allocation10 + $0x18] sm:$0xff]  ;;  %p687_p6 = scmp.ne.s32.totalorder %s414_s3, %s686_s21  ;;  %p691_p7 = scmp.lt.s32.totalorder %s414_s3, %s414_s3 }
  0x71   :  { %522 = vmatpush3.bf16.msra.mxu0 %v519_v3  ;;  %v531_v14 = vpack.c.bf16 %v221_v13, %v220_v12  ;;  %v216_v15 = vld [vmem:[#allocation5] sm:$0xff]  ;;  %v535_v16 = vpack.c.bf16 %v315_v11, %v314_v10  ;;  %v316_v17 = vld [vmem:[#allocation11 + $0x10] sm:$0xff]  ;;  %v317_v18 = vld [vmem:[#allocation11 + $0x18] sm:$0xff]  ;;  %p692_p8 = scmp.lt.s32.totalorder %s686_s21, %s686_s21 }
  0x72   :  { %528 = vmatprep.subr.bf16.mxu1 %v527_v8  ;;  %524 = vmatprep.subr.bf16.mxu0 %v523_v7  ;;  %v120_v19 = vld [vmem:[#allocation2 + $0x8] sm:$0xff]  ;;  %v539_v20 = vpack.c.bf16 %v317_v18, %v316_v17  ;;  %v217_v21 = vld [vmem:[#allocation5 + $0x8] sm:$0xff]  ;;  %v312_v22 = vld [vmem:[#allocation7] sm:$0xff] }
  0x73   :  { %530 = vmatpush3.bf16.msra.mxu1 %v527_v8  ;;  %505 = vmatprep.mubr.msk.f32.mxu1 %vm132_vm0, %v216_v15  ;;  %v313_v23 = vld [vmem:[#allocation7 + $0x8] sm:$0xff]  ;;  %v459_v24 = vld [vmem:[%s1025_s6] ss:$0 sm:$0xff]  ;;  %p693_p9 = por %p692_p8, %p691_p7 }
  0x74   :  { %532 = vmatprep.subr.bf16.mxu1 %v531_v14  ;;  %v462_v25 = vld [vmem:[%s1026_s7] ss:$0 sm:$0xff] }
  0x75   :  { %526 = vmatpush3.bf16.msra.mxu0 %v523_v7  ;;  %v465_v34 = vld [vmem:[%s1027_s8] ss:$0 sm:$0xff]  ;;  %p694_p10 = pnand %p693_p9, %p687_p6 }
  0x76   :  { %536 = vmatprep.subr.bf16.mxu0 %v535_v16 }
  0x77   :  { %534 = vmatpush3.bf16.msra.mxu1 %v531_v14 }
  0x78   :  { %495 = vmatmul.mubr.msk.f32.vlgmr.msra.gmra.mrb[0].mxu0 %vm132_vm0, %v120_v19 }
  0x79   :  { %538 = vmatpush3.bf16.msra.mxu0 %v535_v16  ;;  %516 = vmatprep.mubr.msk.f32.mxu0 %vm132_vm0, %v312_v22 }
  0x7a   :  { %506 = vmatmul.mubr.msk.f32.vlgmr.msra.gmra.mrb[0].mxu1 %vm132_vm0, %v217_v21  ;;  %540 = vmatprep.subr.bf16.mxu0 %v539_v20 }
  0x7d   :  { %542 = vmatpush3.bf16.msra.mxu0 %v539_v20 }
  0x80   :  { %517 = vmatmul.mubr.msk.f32.vlgmr.msra.gmra.mrb[2].mxu0 %vm132_vm0, %v313_v23 }
 0x14b   :  { %v496_v26 = vpop.f32.mrb[0].mxu0 }
 0x14c   :  { %v211_v27 = vadd.f32 %v496_v26, %v459_v24  ;;  %v205_v28 = vpop.f32.mrb[1].mxu0 }
 0x14d   :  { %v507_v29 = vpop.f32.mrb[0].mxu1  ;;  %v206_v30 = vadd.f32 %v459_v24, %v205_v28 }
 0x14e   :  { %v307_v31 = vadd.f32 %v507_v29, %v462_v25  ;;  %v301_v32 = vpop.f32.mrb[1].mxu1  ;;  %215 = vst.msk [vmem:[#allocation13 + $0x8] sm:$0xff] %vm132_vm0, %v211_v27 }
 0x14f   :  { %v302_v33 = vadd.f32 %v462_v25, %v301_v32  ;;  %214 = vst.msk [vmem:[#allocation13] sm:$0xff] %vm132_vm0, %v206_v30 }
 0x150   :  { %311 = vst.msk [vmem:[#allocation14 + $0x8] sm:$0xff] %vm132_vm0, %v307_v31 }
 0x151   :  { %310 = vst.msk [vmem:[#allocation14] sm:$0xff] %vm132_vm0, %v302_v33 }
 0x152   :  { %697 = shalt.err (!%p694_p10)
}
 0x153   :  { %s698_s27 = scalar_lea.hbm %s1028_s9, 256 }
 0x154   :  { %p699_p11 = scmp.ne.s32.totalorder %s1028_s9, %s698_s27  ;;  %p702_p12 = scmp.lt.u32.totalorder %s698_s27, %s1028_s9 }
 0x156   :  { %p704_p13 = pnand %p702_p12, %p699_p11 }
 0x158   :  { %707 = shalt.err (!%p704_p13)
}
 0x159   :  { %419 = dma.vmem_to_hbm [thread:$0]  %s414_s3, 256, %s1028_s9, [#allocation4], %s766_s29, %s766_s29, %s767_s30  }
 0x15a   :  { %s708_s28 = scalar_lea.vmem %s959_s19, 256  ;;  %p713_p1 = scmp.lt.s32.totalorder %s959_s19, %s959_s19 }
 0x15b   :  { %p709_p0 = scmp.ne.s32.totalorder %s959_s19, %s708_s28  ;;  %p714_p2 = scmp.lt.s32.totalorder %s708_s28, %s708_s28 }
 0x15d   :  { %p715_p3 = por %p714_p2, %p713_p1 }
 0x15f   :  { %p716_p4 = pnand %p715_p3, %p709_p0 }
 0x161   :  { %719 = shalt.err (!%p716_p4)
}
 0x162   :  { %s720_s12 = scalar_lea.hbm %s1029_s10, 256 }
 0x163   :  { %p721_p5 = scmp.ne.s32.totalorder %s1029_s10, %s720_s12  ;;  %p724_p6 = scmp.lt.u32.totalorder %s720_s12, %s1029_s10 }
 0x165   :  { %p726_p7 = pnand %p724_p6, %p721_p5 }
 0x167   :  { %729 = shalt.err (!%p726_p7)
}
 0x168   :  { %431 = dma.vmem_to_hbm [thread:$0]  %s959_s19, 256, %s1029_s10, [#allocation15], %s766_s29, %s766_s29, %s767_s30   ;;  %v518_v35 = vpop.f32.mrb[2].mxu0 }
 0x169   :  { %s774_s16 = smov [#allocation16]   ;;  %v403_v36 = vadd.f32 %v518_v35, %v465_v34  ;;  %v397_v37 = vpop.f32.mrb[3].mxu0 }
 0x16a   :  { %s437_s17 = sshll.u32 %s774_s16, 4  ;;  %v398_v38 = vadd.f32 %v465_v34, %v397_v37  ;;  %s438_s17 = int_to_ptr.vmem [resolvable:$true] %s437_s17 }
 0x16b   :  { %407 = vst.msk [vmem:[#allocation16 + $0x8] sm:$0xff] %vm132_vm0, %v403_v36  ;;  %s730_s3 = scalar_lea.vmem %s438_s17, 256  ;;  %p735_p9 = scmp.lt.s32.totalorder %s438_s17, %s438_s17 }
 0x16c   :  { %406 = vst.msk [vmem:[#allocation16] sm:$0xff] %vm132_vm0, %v398_v38  ;;  %p731_p8 = scmp.ne.s32.totalorder %s438_s17, %s730_s3  ;;  %p736_p10 = scmp.lt.s32.totalorder %s730_s3, %s730_s3 }
 0x16e   :  { %p737_p11 = por %p736_p10, %p735_p9 }
 0x170   :  { %p738_p12 = pnand %p737_p11, %p731_p8 }
 0x172   :  { %741 = shalt.err (!%p738_p12)
}
 0x173   :  { %s742_s19 = scalar_lea.hbm %s1030_s11, 256 }
 0x174   :  { %p743_p13 = scmp.ne.s32.totalorder %s1030_s11, %s742_s19  ;;  %p746_p0 = scmp.lt.u32.totalorder %s742_s19, %s1030_s11 }
 0x176   :  { %p748_p1 = pnand %p746_p0, %p743_p13 }
 0x178   :  { %751 = shalt.err (!%p748_p1)
}
 0x179   :  { %443 = dma.vmem_to_hbm [thread:$0]  %s438_s17, 256, %s1030_s11, [#allocation15], %s766_s29, %s766_s29, %s767_s30  }
 0x17a   :  { %760 = dma.done.wait [#allocation4], 256  }
 0x17b   :  { %761 = vsyncadd [#allocation4], 4294967040 }
 0x17c   :  { %762 = dma.done.wait [#allocation15], 512  }
 0x17d   :  { %763 = vsyncadd [#allocation15], 4294966784 }
 0x17e   :  { %453 = vsyncpa [#allocation3], 1 }
 0x17f   :  { %454 = vsyncpa [#allocation6], 1 }
 0x180   :  { %455 = vsyncpa [#allocation9], 1 }
 0x181   :  { %456 = vsyncpa [#allocation12], 1 }
 0x182   :  { %457 = vsyncpa [#allocation4], 1 }
 0x183   :  { %458 = vsyncpa [#allocation15], 1 }

</bundles_post_ra>
